<compile_context>
chip_gen: v6e
topology: v6e:2x2x1
jax: 0.10.0
libtpu: 0.0.40
codegen_flags: <defaults>
</compile_context>

<pallas_src>
import functools
import math

import jax
import jax.numpy as jnp
from jax.experimental import pallas as pl
from jax.experimental.pallas import tpu as pltpu


# ---------------------------------------------------------------------------
# Hardware-aware VMEM budgeting / tiling helpers
# ---------------------------------------------------------------------------
_MAX_IN_BLOCK_BYTES = 8 * 1024 * 1024   # past ~8 MiB the HBM-roofline gain is negligible


def _round_up(v, m):
    return ((v + m - 1) // m) * m


def _cdiv(a, b):
    return -(-a // b)


@functools.lru_cache(maxsize=None)
def _vmem_caps():
    """(compiler vmem_limit_bytes, usable per-call VMEM budget bytes) for this chip."""
    phys = 64 * 1024 * 1024              # conservative fallback (v7x per-core VMEM)
    try:
        info = pltpu.get_tpu_info()
        v = getattr(info, "vmem_capacity_bytes", None)
        if v:
            phys = int(v)
    except Exception:
        pass
    limit = min((phys * 3) // 4, 96 * 1024 * 1024)    # v7x: 48 MiB, 128 MiB parts: 96 MiB
    budget = min((phys * 9) // 16, 72 * 1024 * 1024)  # v7x: 36 MiB, 128 MiB parts: 72 MiB
    return limit, budget


def _sublane_granule(itemsize):
    # Packed sublane tile: 8 for 4-byte, 16 for 2-byte, 32 for 1-byte dtypes.
    return 8 * max(1, 4 // max(1, itemsize))


def _budget_elems(itemsize, f32_temps, fixed_bytes=0):
    """Max elements per input block so that double-buffered in/out blocks plus
    the compiler-materialized f32 temporaries fit the per-call VMEM budget."""
    _, budget = _vmem_caps()
    per_elem = 4 * itemsize + 4 * f32_temps          # 2x in + 2x out + f32 temps
    avail = max(per_elem, budget - fixed_bytes)
    elems = avail // per_elem
    return max(1024, min(elems, _MAX_IN_BLOCK_BYTES // itemsize))


def _pick_tile(total, granule, budget_elems, min_steps=4):
    """Tile along one axis: a multiple of `granule` (or the full extent), capped by
    the VMEM element budget, and split into >= min_steps grid steps when the
    extent allows (keeps both v7x TensorCores busy / balanced)."""
    if total <= granule:
        return total                                  # single full-extent block
    budget_tile = max(granule, (budget_elems // granule) * granule)
    tile = total if budget_tile >= total else budget_tile
    steps = _cdiv(total, tile)
    want = min(min_steps, total // granule)
    if want > 1 and steps < want:
        tile = _round_up(_cdiv(total, want), granule)
    return tile


# ---------------------------------------------------------------------------
# Kernels
# ---------------------------------------------------------------------------
def _ln_lanes_kernel(x_ref, w_ref, b_ref, o_ref, *, eps, inv_c):
    """Generic channels_last: block (rows, C); normalize along lanes (last axis)."""
    x = x_ref[...].astype(jnp.float32)
    u = jnp.sum(x, axis=-1, keepdims=True) * inv_c
    xc = x - u
    var = jnp.sum(xc * xc, axis=-1, keepdims=True) * inv_c      # biased var (torch)
    y = xc * jax.lax.rsqrt(var + eps)
    y = y * w_ref[...] + b_ref[...]
    o_ref[...] = y.astype(o_ref.dtype)


def _ln_packed_kernel(x_ref, seg_ref, w_ref, b_ref, o_ref, *, eps, inv_c):
    """Lane-dense small-C channels_last: block (rows_dense, L), L = lcm(C, 128).
    Each lane row packs L/C consecutive logical rows.  seg_ref is an (L, L)
    block-diagonal ones matrix: x @ seg sums every width-C segment and broadcasts
    the sum back into all lanes of that segment (one MXU matmul per statistic)."""
    x = x_ref[...].astype(jnp.float32)
    seg = seg_ref[...]
    u = jnp.dot(x, seg, preferred_element_type=jnp.float32) * inv_c
    xc = x - u
    var = jnp.dot(xc * xc, seg, preferred_element_type=jnp.float32) * inv_c
    y = xc * jax.lax.rsqrt(var + eps)
    y = y * w_ref[...] + b_ref[...]
    o_ref[...] = y.astype(o_ref.dtype)


def _ln_sublanes_kernel(x_ref, w_ref, b_ref, o_ref, *, eps, inv_c):
    """channels_first: block (C, hw_tile); C on sublanes, spatial lane-dense."""
    x = x_ref[...].astype(jnp.float32)
    u = jnp.sum(x, axis=0, keepdims=True) * inv_c
    xc = x - u
    var = jnp.sum(xc * xc, axis=0, keepdims=True) * inv_c       # biased var (torch)
    y = xc * jax.lax.rsqrt(var + eps)
    y = y * w_ref[...] + b_ref[...]                              # (C,1) broadcast across lanes
    o_ref[...] = y.astype(o_ref.dtype)


# ---------------------------------------------------------------------------
# pallas_call wrappers
# ---------------------------------------------------------------------------
def _layer_norm_cl_generic(x2d, weight, bias, eps):
    rows, c = x2d.shape
    itemsize = jnp.dtype(x2d.dtype).itemsize
    granule = _sublane_granule(itemsize)
    block_rows = _pick_tile(rows, granule, _budget_elems(itemsize, 3) // c)
    grid = (_cdiv(rows, block_rows),)
    vmem_limit, _ = _vmem_caps()

    kernel = functools.partial(_ln_lanes_kernel, eps=eps, inv_c=1.0 / c)
    return pl.pallas_call(
        kernel,
        out_shape=jax.ShapeDtypeStruct((rows, c), x2d.dtype),
        grid_spec=pltpu.PrefetchScalarGridSpec(
            num_scalar_prefetch=0,
            grid=grid,
            in_specs=[
                pl.BlockSpec((block_rows, c), lambda i: (i, 0)),
                pl.BlockSpec((1, c), lambda i: (0, 0)),
                pl.BlockSpec((1, c), lambda i: (0, 0)),
            ],
            out_specs=pl.BlockSpec((block_rows, c), lambda i: (i, 0)),
        ),
        compiler_params=pltpu.CompilerParams(
            dimension_semantics=("parallel",),
            vmem_limit_bytes=vmem_limit,
        ),
    )(x2d,
      weight.astype(jnp.float32).reshape(1, c),
      bias.astype(jnp.float32).reshape(1, c))


def _layer_norm_cl_packed(x2d, weight, bias, eps, lanes):
    rows, c = x2d.shape
    rows_per = lanes // c
    rows_dense = rows // rows_per
    x_dense = x2d.reshape(rows_dense, lanes)          # free contiguous reshape, lane-dense

    idx = jnp.arange(lanes, dtype=jnp.int32)
    seg = (idx[:, None] // c == idx[None, :] // c).astype(jnp.float32)  # block-diag ones
    w_dense = jnp.tile(weight.astype(jnp.float32), rows_per).reshape(1, lanes)
    b_dense = jnp.tile(bias.astype(jnp.float32), rows_per).reshape(1, lanes)

    itemsize = jnp.dtype(x2d.dtype).itemsize
    granule = _sublane_granule(itemsize)
    fixed = 2 * lanes * lanes * 4 + 4 * lanes * 4     # seg matrix (dbl-buffered) + w/b
    block_rows = _pick_tile(rows_dense, granule,
                            _budget_elems(itemsize, 4, fixed_bytes=fixed) // lanes)
    grid = (_cdiv(rows_dense, block_rows),)
    vmem_limit, _ = _vmem_caps()

    kernel = functools.partial(_ln_packed_kernel, eps=eps, inv_c=1.0 / c)
    y_dense = pl.pallas_call(
        kernel,
        out_shape=jax.ShapeDtypeStruct((rows_dense, lanes), x2d.dtype),
        grid_spec=pltpu.PrefetchScalarGridSpec(
            num_scalar_prefetch=0,
            grid=grid,
            in_specs=[
                pl.BlockSpec((block_rows, lanes), lambda i: (i, 0)),
                pl.BlockSpec((lanes, lanes), lambda i: (0, 0)),
                pl.BlockSpec((1, lanes), lambda i: (0, 0)),
                pl.BlockSpec((1, lanes), lambda i: (0, 0)),
            ],
            out_specs=pl.BlockSpec((block_rows, lanes), lambda i: (i, 0)),
        ),
        compiler_params=pltpu.CompilerParams(
            dimension_semantics=("parallel",),
            vmem_limit_bytes=vmem_limit,
        ),
    )(x_dense, seg, w_dense, b_dense)
    return y_dense.reshape(rows, c)


def _layer_norm_cf(x3d, weight, bias, eps):
    # x3d: (N, C, HW) -- no transposes; C lives on sublanes inside the kernel.
    n, c, hw = x3d.shape
    itemsize = jnp.dtype(x3d.dtype).itemsize
    hw_tile = _pick_tile(hw, 128, _budget_elems(itemsize, 3) // c,
                         min_steps=_cdiv(4, n))
    grid = (n, _cdiv(hw, hw_tile))
    vmem_limit, _ = _vmem_caps()

    kernel = functools.partial(_ln_sublanes_kernel, eps=eps, inv_c=1.0 / c)
    return pl.pallas_call(
        kernel,
        out_shape=jax.ShapeDtypeStruct((n, c, hw), x3d.dtype),
        grid_spec=pltpu.PrefetchScalarGridSpec(
            num_scalar_prefetch=0,
            grid=grid,
            in_specs=[
                pl.BlockSpec((None, c, hw_tile), lambda i, j: (i, 0, j)),
                pl.BlockSpec((c, 1), lambda i, j: (0, 0)),
                pl.BlockSpec((c, 1), lambda i, j: (0, 0)),
            ],
            out_specs=pl.BlockSpec((None, c, hw_tile), lambda i, j: (i, 0, j)),
        ),
        compiler_params=pltpu.CompilerParams(
            dimension_semantics=("parallel", "parallel"),
            vmem_limit_bytes=vmem_limit,
        ),
    )(x3d,
      weight.astype(jnp.float32).reshape(c, 1),
      bias.astype(jnp.float32).reshape(c, 1))


# ---------------------------------------------------------------------------
# Module wrapper (matches the PyTorch LayerNorm forward semantics)
# ---------------------------------------------------------------------------
class LayerNorm:
    """Pallas port of the PyTorch LayerNorm (channels_last / channels_first)."""

    def __init__(self, normalized_shape, eps=1e-6, data_format="channels_last",
                 weight=None, bias=None):
        if data_format not in ("channels_last", "channels_first"):
            raise NotImplementedError
        self.c = int(normalized_shape)
        self.eps = float(eps)
        self.data_format = data_format
        # Module __init__ uses ones/zeros; allow deterministic overrides so the
        # affine path is actually exercised in the test below.
        self.weight = jnp.ones((self.c,), jnp.float32) if weight is None else jnp.asarray(weight)
        self.bias = jnp.zeros((self.c,), jnp.float32) if bias is None else jnp.asarray(bias)

    def __call__(self, x):
        if self.data_format == "channels_last":
            orig_shape = x.shape
            c = self.c
            assert orig_shape[-1] == c
            x2d = x.reshape(-1, c)
            rows = x2d.shape[0]
            lanes = (c * 128) // math.gcd(c, 128)     # lcm(C, 128)
            if c % 128 != 0 and lanes <= 1024 and rows % (lanes // c) == 0:
                y2d = _layer_norm_cl_packed(x2d, self.weight, self.bias, self.eps, lanes)
            else:
                y2d = _layer_norm_cl_generic(x2d, self.weight, self.bias, self.eps)
            return y2d.reshape(orig_shape)
        else:
            # x: (N, C, *spatial) -> (N, C, prod(spatial)); free contiguous reshape.
            orig_shape = x.shape
            n, c = orig_shape[0], orig_shape[1]
            assert c == self.c
            hw = 1
            for d in orig_shape[2:]:
                hw *= d
            x3d = x.reshape(n, c, hw)
            y3d = _layer_norm_cf(x3d, self.weight, self.bias, self.eps)
            return y3d.reshape(orig_shape)


# ---------------------------------------------------------------------------
# References + test
# ---------------------------------------------------------------------------
def _ref_layernorm_last(x, weight, bias, eps):
    u = jnp.mean(x, axis=-1, keepdims=True)
    s = jnp.mean((x - u) ** 2, axis=-1, keepdims=True)
    return (x - u) / jnp.sqrt(s + eps) * weight + bias


def _ref_layernorm_first(x, weight, bias, eps):
    u = jnp.mean(x, axis=1, keepdims=True)
    s = jnp.mean((x - u) ** 2, axis=1, keepdims=True)
    xn = (x - u) / jnp.sqrt(s + eps)
    return weight[None, :, None, None] * xn + bias[None, :, None, None]


if __name__ == "__main__":
    key = jax.random.PRNGKey(0)
    k1, k2, k3, k4, k5 = jax.random.split(key, 5)

    C = 4
    eps = 1e-6
    # Deterministic, non-trivial affine params (shapes match nn.Parameter(torch.ones(C))).
    weight = 1.0 + 0.1 * jax.random.normal(k3, (C,), jnp.float32)
    bias = 0.1 * jax.random.normal(k4, (C,), jnp.float32)

    # channels_first: NCHW (2, 4, 16, 16) -- native C-on-sublanes path, no transposes.
    x_cf = jax.random.normal(k1, (2, C, 16, 16), jnp.float32)
    ln_cf = LayerNorm(C, eps=eps, data_format="channels_first", weight=weight, bias=bias)
    y_cf = jax.block_until_ready(ln_cf(x_cf))
    y_cf_ref = _ref_layernorm_first(x_cf, weight, bias, eps)
    assert jnp.allclose(y_cf, y_cf_ref, atol=1e-5, rtol=1e-5), "channels_first mismatch"

    # channels_last: NHWC (2, 16, 16, 4) -- rows % (lcm(4,128)/4)=32 == 0 -> lane-dense path.
    x_cl = jax.random.normal(k2, (2, 16, 16, C), jnp.float32)
    ln_cl = LayerNorm(C, eps=eps, data_format="channels_last", weight=weight, bias=bias)
    y_cl = jax.block_until_ready(ln_cl(x_cl))
    y_cl_ref = _ref_layernorm_last(x_cl, weight, bias, eps)
    assert jnp.allclose(y_cl, y_cl_ref, atol=1e-5, rtol=1e-5), "channels_last (packed) mismatch"

    # channels_last with row count NOT divisible by 32 -> exercises the generic fallback.
    x_cl2 = jax.random.normal(k5, (2, 15, 15, C), jnp.float32)
    y_cl2 = jax.block_until_ready(ln_cl(x_cl2))
    y_cl2_ref = _ref_layernorm_last(x_cl2, weight, bias, eps)
    assert jnp.allclose(y_cl2, y_cl2_ref, atol=1e-5, rtol=1e-5), "channels_last (generic) mismatch"

    print("KERNEL_OK")
</pallas_src>

<mosaic_0001>
module attributes {stable_mosaic.version = 11 : i64} {
  func.func @_ln_sublanes_kernel(%arg0: i32, %arg1: i32, %arg2: memref<1x4x128xf32, #tpu.memory_space<vmem>>, %arg3: memref<4x1xf32, #tpu.memory_space<vmem>>, %arg4: memref<4x1xf32, #tpu.memory_space<vmem>>, %arg5: memref<1x4x128xf32, #tpu.memory_space<vmem>>) attributes {dimension_semantics = [#tpu.dimension_semantics<parallel>, #tpu.dimension_semantics<parallel>], iteration_bounds = array<i64: 2, 2>, scalar_prefetch = 0 : i64, scratch_operands = 0 : i64, tpu.core_type = #tpu.core_type<tc>, window_params = [{transform_indices = @transform_0, window_bounds = array<i64: 1, 4, 128>}, {pipeline_mode = #tpu.pipeline_mode<synchronous>, transform_indices = @transform_1, window_bounds = array<i64: 4, 1>}, {pipeline_mode = #tpu.pipeline_mode<synchronous>, transform_indices = @transform_2, window_bounds = array<i64: 4, 1>}, {transform_indices = @transform_3, window_bounds = array<i64: 1, 4, 128>}]} {
    %c0 = arith.constant 0 : index
    %c0_0 = arith.constant 0 : index
    %c0_1 = arith.constant 0 : index
    %0 = vector.load %arg2[%c0, %c0_0, %c0_1] : memref<1x4x128xf32, #tpu.memory_space<vmem>>, vector<1x4x128xf32>
    %1 = vector.shape_cast %0 : vector<1x4x128xf32> to vector<4x128xf32>
    %cst = arith.constant dense<0.000000e+00> : vector<128xf32>
    %2 = vector.multi_reduction <add>, %1, %cst [0] : vector<4x128xf32> to vector<128xf32>
    %3 = vector.shape_cast %2 : vector<128xf32> to vector<1x128xf32>
    %cst_2 = arith.constant 2.500000e-01 : f32
    %4 = vector.broadcast %cst_2 : f32 to vector<1x128xf32>
    %5 = arith.mulf %3, %4 : vector<1x128xf32>
    %6 = vector.broadcast %5 : vector<1x128xf32> to vector<4x128xf32>
    %7 = arith.subf %1, %6 : vector<4x128xf32>
    %8 = arith.mulf %7, %7 : vector<4x128xf32>
    %cst_3 = arith.constant dense<0.000000e+00> : vector<128xf32>
    %9 = vector.multi_reduction <add>, %8, %cst_3 [0] : vector<4x128xf32> to vector<128xf32>
    %10 = vector.shape_cast %9 : vector<128xf32> to vector<1x128xf32>
    %cst_4 = arith.constant 2.500000e-01 : f32
    %11 = vector.broadcast %cst_4 : f32 to vector<1x128xf32>
    %12 = arith.mulf %10, %11 : vector<1x128xf32>
    %cst_5 = arith.constant 9.99999997E-7 : f32
    %13 = vector.broadcast %cst_5 : f32 to vector<1x128xf32>
    %14 = arith.addf %12, %13 : vector<1x128xf32>
    %15 = math.rsqrt %14 : vector<1x128xf32>
    %16 = vector.broadcast %15 : vector<1x128xf32> to vector<4x128xf32>
    %17 = arith.mulf %7, %16 : vector<4x128xf32>
    %c0_6 = arith.constant 0 : index
    %c0_7 = arith.constant 0 : index
    %18 = vector.load %arg3[%c0_6, %c0_7] : memref<4x1xf32, #tpu.memory_space<vmem>>, vector<4x1xf32>
    %19 = vector.broadcast %18 : vector<4x1xf32> to vector<4x128xf32>
    %20 = arith.mulf %17, %19 : vector<4x128xf32>
    %c0_8 = arith.constant 0 : index
    %c0_9 = arith.constant 0 : index
    %21 = vector.load %arg4[%c0_8, %c0_9] : memref<4x1xf32, #tpu.memory_space<vmem>>, vector<4x1xf32>
    %22 = vector.broadcast %21 : vector<4x1xf32> to vector<4x128xf32>
    %23 = arith.addf %20, %22 : vector<4x128xf32>
    %c0_10 = arith.constant 0 : index
    %c0_11 = arith.constant 0 : index
    %c0_12 = arith.constant 0 : index
    %24 = vector.load %arg5[%c0_10, %c0_11, %c0_12] : memref<1x4x128xf32, #tpu.memory_space<vmem>>, vector<1x4x128xf32>
    %25 = vector.shape_cast %24 : vector<1x4x128xf32> to vector<4x128xf32>
    %26 = vector.shape_cast %23 : vector<4x128xf32> to vector<1x4x128xf32>
    tpu.vector_store %arg5[%c0_10, %c0_11, %c0_12], %26 {strides = array<i32>} : memref<1x4x128xf32, #tpu.memory_space<vmem>>, vector<1x4x128xf32>,
    return
  }
  func.func @transform_0(%arg0: i32, %arg1: i32) -> (i32, i32, i32) {
    %c0_i32 = arith.constant 0 : i32
    %c0_i32_0 = arith.constant 0 : i32
    return %arg0, %c0_i32, %arg1 : i32, i32, i32
  }
  func.func @transform_1(%arg0: i32, %arg1: i32) -> (i32, i32) {
    %c0_i32 = arith.constant 0 : i32
    %c0_i32_0 = arith.constant 0 : i32
    %c0_i32_1 = arith.constant 0 : i32
    return %c0_i32, %c0_i32_0 : i32, i32
  }
  func.func @transform_2(%arg0: i32, %arg1: i32) -> (i32, i32) {
    %c0_i32 = arith.constant 0 : i32
    %c0_i32_0 = arith.constant 0 : i32
    %c0_i32_1 = arith.constant 0 : i32
    return %c0_i32, %c0_i32_0 : i32, i32
  }
  func.func @transform_3(%arg0: i32, %arg1: i32) -> (i32, i32, i32) {
    %c0_i32 = arith.constant 0 : i32
    %c0_i32_0 = arith.constant 0 : i32
    return %arg0, %c0_i32, %arg1 : i32, i32, i32
  }
}

</mosaic_0001>

<bundles_post_ra>
// kernel: tpu_custom_call.1
= control target key start
LH: loop header
LB: loop body
LE: loop exit
PB: predicated region body
PF: predicated region fallthrough
CT: control target
= control target key end

     0   :  { %8 = vsyncpa [#allocation3], 0  ;;  %s755_s0 = inlined_call_operand.hbm [shape: f32[2,4,256], index: 0, kind: input, shape index: {}]   ;;  %s756_s1 = inlined_call_operand.vmem [shape: f32[4,1], index: 1, kind: input, shape index: {}]   ;;  %s757_s2 = inlined_call_operand.vmem [shape: f32[4,1], index: 2, kind: input, shape index: {}]   ;;  %s758_s3 = inlined_call_operand.hbm [shape: f32[2,4,256], index: 3, kind: output, shape index: {}]  }
   0x1   :  { %10 = vsyncpa [#allocation3 + $0x1], 0 }
   0x2   :  { %11 = vsyncpa [#allocation4], 0 }
   0x3   :  { %13 = vsyncpa [#allocation4 + $0x1], 0  ;;  %s589_s12 = smov 0   ;;  %s591_s13 = smov 0  }
   0x4   :  { %s593_s14 = smov 0   ;;  %s595_s15 = smov 0  }
   0x5   :  { %s597_s16 = smov 0   ;;  %s599_s17 = smov 0  }
   0x6   :  { %s601_s18 = smov 0   ;;  %s603_s19 = smov 0  }
   0x7 LB: > { %s343_s20 = sadd.s32 4294967295, %s564_s19   ;;  %s344_s21 = sadd.s32 4294967294, %s564_s19   ;;  %s564_s19 = sphi %s603_s19, %s19_s19   ;;  %s560_s18 = sphi %s601_s18, %s774_s18   ;;  %s556_s17 = sphi %s599_s17, %s773_s17   ;;  %s552_s16 = sphi %s597_s16, %s772_s16   ;;  %s548_s15 = sphi %s595_s15, %s771_s15   ;;  %s544_s14 = sphi %s593_s14, %s770_s14   ;;  %s540_s13 = sphi %s591_s13, %s769_s13   ;;  %s536_s12 = sphi %s589_s12, %s768_s12  }
   0x8   : > { %s28_s22 = sadd.s32 1, %s556_s17  ;;  %s31_s23 = sadd.s32 1, %s560_s18 }
   0x9   : > { %p29_p0 = scmp.ge.s32.totalorder %s28_s22, 2  ;;  %s40_s24 = sadd.s32 1, %s544_s14 }
   0xa   : > { %p47_p1 = scmp.ne.s32.totalorder %s544_s14, %s540_s13  ;;  %p48_p2 = scmp.eq.s32.totalorder %s564_s19, 0 }
   0xb   : > { %s776_s22 = smov (%p29_p0, %s28_s22), 0  ;;  %s778_s23 = smov (!%p29_p0, %s31_s23), %s560_s18 }
   0xc   : > { %s36_s25 = ssub.s32 %s556_s17, %s776_s22  ;;  %p642_p3 = por %p48_p2, %p47_p1 }
   0xd   : > { %p33_p4 = scmp.ge.s32.totalorder %s778_s23, 2  ;;  %p53_p5 = scmp.ne.s32.totalorder %s540_s13, %s536_s12 }
   0xe   : > { %p54_p6 = scmp.eq.s32.totalorder %s343_s20, 0  ;;  %p121_p7 = scmp.eq.s32.totalorder %s343_s20, 3 }
   0xf   : > { %s780_s23 = smov (%p33_p4, %s778_s23), 0  ;;  %p127_p10 = scmp.eq.s32.totalorder %s344_s21, 3 }
  0x10   : > { %761 = sst [smem:[#allocation8_spill]] %s780_s23  ;;  %p650_p8 = por %p54_p6, %p53_p5 }
  0x11   : > { %p654_p9 = por %p121_p7, %p47_p1  ;;  %s35_s29 = ssub.s32 %s560_s18, %s780_s23 }
  0x12   : > { %s37_s30 = sor.u32 %s36_s25, %s35_s29  ;;  %p660_p12 = por %p127_p10, %p53_p5 }
  0x13   : > { %p38_p11 = scmp.eq.s32.totalorder %s37_s30, 0  ;;  %p370_p13 = scmp.lt.s32.totalorder %s564_s19, 4 }
  0x14   : > { %s764_s4 = scalar_select %p660_p12, 1, 0 }
  0x15   : > { %s153_s5 = sand.u32 1, %s544_s14   ;;  %s348_s8 = sshll.u32 %s560_s18, 1 }
  0x16   : > { %s667_s6 = scalar_select %p38_p11, %s544_s14, %s40_s24  }
  0x17   : > { %s347_s7 = sshll.u32 %s153_s5, 2  ;;  %s162_s9 = sadd.s32 %s556_s17, %s348_s8 }
  0x18   : > { %s157_s10 = scalar_lea.vmem [#allocation2], %s347_s7  ;;  %s349_s20 = sshll.u32 %s162_s9, 6 }
  0x19   : > { %s166_s11 = sshll.u32 %s157_s10, 4  ;;  %s164_s25 = scalar_lea.hbm %s755_s0, %s349_s20  ;;  %s167_s11 = int_to_ptr.vmem [resolvable:$true] %s166_s11 }
  0x1a   : > { %p676_p0 = pnand %p370_p13, %p642_p3  ;;  %p350_p1 = scmp.ge.s32.totalorder %s564_s19, 1 }
  0x1b   : > { %p171_p2 = scmp.lt.s32.totalorder %s564_s19, 5  ;;  %s154_s24 = scalar_lea.sflag [#allocation3], %s153_s5 }
  0x1c   : > { %p442_p4 = pneg %p676_p0  ;;  %s453_s30 = scalar_lea.vmem %s167_s11, 64 }
  0x1d   : > { %p454_p5 = scmp.ne.s32.totalorder %s167_s11, %s453_s30  ;;  %s566_s7 = smov [#allocation2]  }
  0x1e   : > { %s458_s8 = sshll.u32 %s566_s7, 4  ;;  %s459_s8 = int_to_ptr.vmem [resolvable:$false] %s458_s8 }
  0x1f   : > { %p456_p6 = pnand %p454_p5, %p442_p4  ;;  %s460_s23 = scalar_lea.vmem %s459_s8, 128 }
  0x20   : > { %p461_p10 = scmp.lt.s32.totalorder %s167_s11, %s459_s8  ;;  %p462_p11 = scmp.lt.s32.totalorder %s460_s23, %s453_s30 }
  0x21   : > { %p457_p7 = pneg %p456_p6 }
  0x22   : > { %p463_p3 = por %p462_p11, %p461_p10 }
  0x24   : > { %p464_p13 = pnand %p463_p3, %p457_p7 }
  0x26   : > { %467 = shalt.err (!%p464_p13)
}
  0x27   : > { %365 = dma.hbm_to_vmem [thread:$0]  (!%p676_p0), %s164_s25, 64, %s167_s11, %s154_s24  }
  0x28   : > { %p172_p12 = pnand %p350_p1, %p171_p2 }
  0x29   : > { %s691_s26 = sand.u32 (!%p172_p12), 1, %s540_s13  }
  0x2a   : > { %175 = sbr.rel (%p172_p12) target bundleno = 193 (0xc1), region = 32  ;;  %s351_s5 = sshll.u32 (!%p172_p12), %s691_s26, 2 }
  0x2b   : > { %s178_s9 = scalar_lea.sflag (!%p172_p12), [#allocation3], %s691_s26  ;;  %s181_s10 = scalar_lea.vmem (!%p172_p12), [#allocation2], %s351_s5 }
  0x2f   : > { %527 = dma.done.wait (%p650_p8), %s178_s9, 64  }
  0x30   : > { %529 = vsyncadd (%p650_p8), %s178_s9, 4294967232  ;;  %v567_v0 = vmov 0   ;;  %v227_v1 = vld [vmem:[%s756_s1] sm:$0xf]  ;;  %vm205_vm0 = vcmask 1043456   ;;  %s354_s27 = sshll.u32 %s552_s16, 1 }
  0x31   : > { %437 = vset.pattern.permute.xlu0 %v567_v0  ;;  %v234_v2 = vld [vmem:[%s757_s2] sm:$0xf]  ;;  %s254_s29 = sadd.s32 %s548_s15, %s354_s27  ;;  %s203_s30 = scalar_lea.vmem [#allocation5], %s351_s5 }
  0x32   : > { %230 = vperm.xlu0 %437, %v227_v1   ;;  %v204_v3 = vld [vmem:[%s181_s10] sm:$0xf]  ;;  %s355_s24 = sshll.u32 %s254_s29, 6  ;;  %s258_s7 = sshll.u32 %s203_s30, 4  ;;  %s259_s7 = int_to_ptr.vmem [resolvable:$true] %s258_s7 }
  0x33   : > { %v206_v4 = vsel %vm205_vm0, %v204_v3, 0.0  ;;  %s256_s9 = scalar_lea.hbm %s758_s3, %s355_s24  ;;  %s243_s10 = scalar_lea.sflag [#allocation4], %s691_s26 }
  0x34   : > { %v207_v5 = vrot.slane %v206_v4, 4  ;;  %s468_s11 = scalar_lea.vmem %s259_s7, 64  ;;  %s568_s15 = smov [#allocation5]  }
  0x35   : > { %p469_p8 = scmp.ne.s32.totalorder %s259_s7, %s468_s11  ;;  %s472_s16 = sshll.u32 %s568_s15, 4  ;;  %s473_s16 = int_to_ptr.vmem [resolvable:$false] %s472_s16 }
  0x36   : > { %237 = vperm.xlu0 %437, %v234_v2   ;;  %v208_v6 = vadd.f32 %v207_v5, %v206_v4  ;;  %s474_s5 = scalar_lea.vmem %s473_s16, 128  ;;  %p475_p1 = scmp.lt.s32.totalorder %s259_s7, %s473_s16 }
  0x37   : > { %p470_p12 = pnand %p469_p8, %p654_p9  ;;  %p476_p2 = scmp.lt.s32.totalorder %s474_s5, %s468_s11 }
  0x38   : > { %v209_v7 = vrot.slane %v208_v6, 2 }
  0x39   : > { %p471_p0 = pneg %p470_p12  ;;  %p477_p4 = por %p476_p2, %p475_p1 }
  0x3a   : > { %v210_v8 = vadd.f32 %v209_v7, %v208_v6 }
  0x3b   : > { %p478_p5 = pnand %p477_p4, %p471_p0 }
  0x3c   : > { %v211_v9 = vrot.slane %v210_v8, 1 }
  0x3e   : > { %v212_v10 = vadd.f32 %v211_v9, %v210_v8 }
  0x40   : > { %v213_v11 = vmul.f32 0.25, %v212_v10 }
  0x42   : > { %v214_v12 = vsub.f32 %v204_v3, %v213_v11 }
  0x44   : > { %v215_v13 = vmul.f32 %v214_v12, %v214_v12 }
  0x46   : > { %v216_v14 = vsel %vm205_vm0, %v215_v13, 0.0 }
  0x47   : > { %v217_v15 = vrot.slane %v216_v14, 4 }
  0x49   : > { %v218_v16 = vadd.f32 %v217_v15, %v216_v14 }
  0x4b   : > { %v219_v17 = vrot.slane %v218_v16, 2 }
  0x4d   : > { %v220_v18 = vadd.f32 %v219_v17, %v218_v16 }
  0x4f   : > { %v221_v19 = vrot.slane %v220_v18, 1 }
  0x51   : > { %v222_v20 = vadd.f32 %v221_v19, %v220_v18 }
  0x53   : > { %v223_v21 = vmul.f32 0.25, %v222_v20 }
  0x55   : > { %v224_v22 = vadd.f32 1e-06, %v223_v21 }
  0x57   : > { %438 = vrsqrt.f32 %v224_v22 }
  0x64   : > { %v439_v23 = vpop.eup %438 }
  0x65   : > { %v226_v24 = vmul.f32 %v439_v23, %v214_v12 }
  0xad   : > { %v231_v25 = vpop.permute.xlu0 %230 }
  0xae   : > { %v233_v26 = vmul.f32 %v231_v25, %v226_v24 }
  0xb1   : > { %v238_v27 = vpop.permute.xlu0 %237 }
  0xb2   : > { %v240_v28 = vadd.f32 %v238_v27, %v233_v26 }
  0xb4   : > { %241 = vst [vmem:[%s203_s30] sm:$0xf] %v240_v28 }
  0xb5   : > { %481 = shalt.err (!%p478_p5)
}
  0xb6   : > { %s482_s20 = scalar_lea.hbm %s256_s9, 64  ;;  %s486_s25 = scalar_lea.hbm %s758_s3, 256 }
  0xb7   : > { %p483_p6 = scmp.ne.s32.totalorder %s256_s9, %s482_s20  ;;  %p487_p11 = scmp.lt.s32.totalorder %s256_s9, %s758_s3 }
  0xb8   : > { %p488_p3 = scmp.lt.s32.totalorder %s486_s25, %s482_s20 }
  0xb9   : > { %p484_p7 = pnand %p483_p6, %p654_p9 }
  0xba   : > { %p489_p13 = por %p488_p3, %p487_p11 }
  0xbb   : > { %p485_p10 = pneg %p484_p7 }
  0xbd   : > { %p490_p8 = pnand %p489_p13, %p485_p10 }
  0xbf   : > { %493 = shalt.err (!%p490_p8)
}
  0xc0   : > { %360 = dma.vmem_to_hbm [thread:$0]  (%p654_p9), %s259_s7, 64, %s256_s9, %s243_s10  }
  0xc1 PF: > { %p371_p12 = scmp.ge.s32.totalorder %s564_s19, 2  ;;  %s270_s24 = sand.u32 1, %s536_s12  }
  0xc2   : > { %p766_p0 = scmp.ne.s32.totalorder %s764_s4, 0  ;;  %s271_s30 = scalar_lea.sflag [#allocation4], %s270_s24 }
  0xc4   : > { %p367_p1 = pnand %p371_p12, %p766_p0 }
  0xc6   : > { %p368_p2 = pneg %p367_p1 }
  0xc8   : > { %531 = dma.done.wait (%p368_p2), %s271_s30, 64  }
  0xc9   : > { %533 = vsyncadd (%p368_p2), %s271_s30, 4294967232  ;;  %s19_s19 = sadd.s32 1, %s564_s19   ;;  %s767_s28 = sld [smem:[#allocation8_spill]] }
  0xca   : > { %p16_p4 = scmp.ge.s32.totalorder %s19_s19, 6   ;;  %s768_s12 = smov %s540_s13 }
  0xcb   : > { %s769_s13 = smov %s544_s14  ;;  %s770_s14 = smov %s667_s6 }
  0xcc   : > { %s771_s15 = smov %s556_s17  ;;  %s772_s16 = smov %s560_s18 }
  0xcd   : > { %s773_s17 = smov %s776_s22  ;;  %18 = sbr.rel (!%p16_p4) target bundleno = 7 (0x7), region = 77 }
  0xcf   : > { %s774_s18 = smov %s767_s28 }
  0xd2   :  { %276 = vsyncpa [#allocation3], 1 }
  0xd3   :  { %278 = vsyncpa [#allocation3 + $0x1], 1 }
  0xd4   :  { %279 = vsyncpa [#allocation4], 1 }
  0xd5   :  { %281 = vsyncpa [#allocation4 + $0x1], 1 }

</bundles_post_ra>
